<compile_context>
chip_gen: v6e
topology: v6e:2x2x1
jax: 0.10.0
libtpu: 0.0.40
codegen_flags: <defaults>
</compile_context>

<pallas_src>
import functools

import jax
import jax.numpy as jnp
from jax.experimental import pallas as pl
from jax.experimental.pallas import tpu as pltpu


def _fir_kernel_bias(x_ref, w_ref, b_ref, o_ref, *, compute_dtype):
    x = x_ref[...]
    w = w_ref[...]
    if compute_dtype is not None:
        x = x.astype(compute_dtype)       # in-kernel VPU cast (no wrapper HBM pass)
        w = w.astype(compute_dtype)
    acc = jnp.dot(x, w, preferred_element_type=jnp.float32)   # MXU, f32 accumulate
    acc = acc + b_ref[...].astype(jnp.float32)                # (TB,TF) + (1,TF)
    o_ref[...] = acc.astype(o_ref.dtype)


def _fir_kernel_nobias(x_ref, w_ref, o_ref, *, compute_dtype):
    x = x_ref[...]
    w = w_ref[...]
    if compute_dtype is not None:
        x = x.astype(compute_dtype)
        w = w.astype(compute_dtype)
    acc = jnp.dot(x, w, preferred_element_type=jnp.float32)
    o_ref[...] = acc.astype(o_ref.dtype)


@functools.partial(
    jax.jit,
    static_argnames=("dropout", "compute_dtype", "force_pallas", "tb_max", "tf_max"),
)
def fir_layer(
    x,
    weights,
    bias=None,
    dropout=0.0,
    *,
    compute_dtype=None,      # None -> compute in the native dtype (PyTorch semantics)
    force_pallas=False,
    tb_max=512,              # must be a multiple of 8
    tf_max=2048,             # must be a multiple of 128
):
    """Pallas implementation of Fir_Layer.forward.

    x:       (B, W, 1)
    weights: (W, F)
    bias:    (1, F) / (F,) or None
    returns: (B, 1, F) in x.dtype
    """
    assert x.ndim == 3 and x.shape[-1] == 1
    assert tb_max % 8 == 0 and tf_max % 128 == 0
    if dropout != 0.0:
        # TODO(synk): training-mode nn.Dropout (p>0) not implemented; p=0 / eval is identity.
        raise NotImplementedError("fir_layer: dropout > 0 is not supported")

    B, W, _ = x.shape
    Wf, F = weights.shape
    assert W == Wf
    out_dtype = x.dtype

    x2d = jnp.squeeze(x, axis=-1)                     # (B, W), layout no-op

    # --- Tiny-problem fallback: kernel dispatch + DMA setup would dominate. ---
    out_bytes = B * F * jnp.dtype(out_dtype).itemsize
    if not force_pallas and out_bytes < (512 << 10):
        xm = x2d if compute_dtype is None else x2d.astype(compute_dtype)
        wm = weights if compute_dtype is None else weights.astype(compute_dtype)
        y = jnp.dot(xm, wm, preferred_element_type=jnp.float32)
        if bias is not None:
            y = y + jnp.reshape(bias, (1, F)).astype(jnp.float32)
        return y.astype(out_dtype).reshape(B, 1, F)

    # --- Tile selection (no wrapper padding; ragged edges masked by Pallas). --
    # Block dims either equal the full array dim or are multiples of (8, 128),
    # satisfying the TPU block-shape constraint in every case.
    TB = B if B <= tb_max else tb_max
    TF = F if F <= tf_max else tf_max
    grid = (pl.cdiv(B, TB), pl.cdiv(F, TF))           # batch tiles lead (megacore)

    in_specs = [
        pl.BlockSpec((TB, W), lambda i, j: (i, 0)),   # x tile, resident along F axis
        pl.BlockSpec((W, TF), lambda i, j: (0, j)),   # weight tile (tiny: W x TF)
    ]
    operands = [x2d, weights]
    if bias is not None:
        operands.append(jnp.reshape(bias, (1, F)))
        in_specs.append(pl.BlockSpec((1, TF), lambda i, j: (0, j)))
        kernel = functools.partial(_fir_kernel_bias, compute_dtype=compute_dtype)
    else:
        kernel = functools.partial(_fir_kernel_nobias, compute_dtype=compute_dtype)

    out2d = pl.pallas_call(
        kernel,
        out_shape=jax.ShapeDtypeStruct((B, F), out_dtype),
        grid=grid,
        in_specs=in_specs,
        out_specs=pl.BlockSpec((TB, TF), lambda i, j: (i, j)),
        compiler_params=pltpu.CompilerParams(
            dimension_semantics=("parallel", "parallel"),
            vmem_limit_bytes=48 << 20,                # fits v7x 64 MiB; fine on v5e/v6e
        ),
    )(*operands)

    return out2d.reshape(B, 1, F)                     # == x.view(B, 1, F)


if __name__ == "__main__":
    key = jax.random.PRNGKey(0)
    kx, kw, kb, kx2, kw2, kx3, kw3, kb3 = jax.random.split(key, 8)

    # ---- Test A: small shape, native f32 compute, with bias -----------------
    B, W, F = 8, 16, 32                               # batch, window, output_features
    x = jax.random.normal(kx, (B, W, 1), dtype=jnp.float32)
    weights = jax.random.normal(kw, (W, F), dtype=jnp.float32) * 0.1
    bias = jax.random.normal(kb, (1, F), dtype=jnp.float32) * 0.01

    out = fir_layer(x, weights, bias, force_pallas=True)
    out = jax.block_until_ready(out)

    ref = (jnp.squeeze(x, -1) @ weights).reshape(B, 1, F) + bias
    assert out.shape == (B, 1, F)
    assert jnp.allclose(out, ref, atol=1e-5, rtol=1e-5)

    # ---- Test B: opt-in bf16 compute (in-kernel cast), no bias --------------
    B2, W2, F2 = 16, 24, 48
    x2 = jax.random.normal(kx2, (B2, W2, 1), dtype=jnp.float32)
    weights2 = jax.random.normal(kw2, (W2, F2), dtype=jnp.float32) * 0.1

    out2 = fir_layer(x2, weights2, None, compute_dtype=jnp.bfloat16, force_pallas=True)
    out2 = jax.block_until_ready(out2)

    ref2 = jnp.dot(
        jnp.squeeze(x2, -1).astype(jnp.bfloat16),
        weights2.astype(jnp.bfloat16),
        preferred_element_type=jnp.float32,
    ).reshape(B2, 1, F2).astype(jnp.float32)
    assert out2.shape == (B2, 1, F2)
    assert jnp.allclose(out2, ref2, atol=1e-2, rtol=1e-2)

    # ---- Test C: ragged B and F (exercise cdiv grid + masked edge tiles) ----
    B3, W3, F3 = 10, 16, 160
    x3 = jax.random.normal(kx3, (B3, W3, 1), dtype=jnp.float32)
    weights3 = jax.random.normal(kw3, (W3, F3), dtype=jnp.float32) * 0.1
    bias3 = jax.random.normal(kb3, (1, F3), dtype=jnp.float32) * 0.01

    out3 = fir_layer(x3, weights3, bias3, force_pallas=True, tb_max=8, tf_max=128)
    out3 = jax.block_until_ready(out3)

    ref3 = (jnp.squeeze(x3, -1) @ weights3).reshape(B3, 1, F3) + bias3
    assert out3.shape == (B3, 1, F3)
    assert jnp.allclose(out3, ref3, atol=1e-5, rtol=1e-5)

    print("KERNEL_OK")
</pallas_src>

<mosaic_0001>
module attributes {stable_mosaic.version = 11 : i64} {
  func.func @_fir_kernel_bias(%arg0: i32, %arg1: i32, %arg2: memref<8x16xf32, #tpu.memory_space<vmem>>, %arg3: memref<16x32xf32, #tpu.memory_space<vmem>>, %arg4: memref<1x32xf32, #tpu.memory_space<vmem>>, %arg5: memref<8x32xf32, #tpu.memory_space<vmem>>) attributes {dimension_semantics = [#tpu.dimension_semantics<parallel>, #tpu.dimension_semantics<parallel>], iteration_bounds = array<i64: 1, 1>, scalar_prefetch = 0 : i64, scratch_operands = 0 : i64, tpu.core_type = #tpu.core_type<tc>, window_params = [{transform_indices = @transform_0, window_bounds = array<i64: 8, 16>}, {transform_indices = @transform_1, window_bounds = array<i64: 16, 32>}, {transform_indices = @transform_2, window_bounds = array<i64: 1, 32>}, {transform_indices = @transform_3, window_bounds = array<i64: 8, 32>}]} {
    %c0 = arith.constant 0 : index
    %c0_0 = arith.constant 0 : index
    %0 = vector.load %arg2[%c0, %c0_0] : memref<8x16xf32, #tpu.memory_space<vmem>>, vector<8x16xf32>
    %c0_1 = arith.constant 0 : index
    %c0_2 = arith.constant 0 : index
    %1 = vector.load %arg3[%c0_1, %c0_2] : memref<16x32xf32, #tpu.memory_space<vmem>>, vector<16x32xf32>
    %cst = arith.constant dense<0.000000e+00> : vector<8x32xf32>
    %2 = tpu.matmul %0, %1, %cst {dimension_numbers = #tpu.dot_dimension_numbers<[1], [0], [0], [1], [0, 0, 1, 1], [], []>} : vector<8x16xf32>, vector<16x32xf32>, vector<8x32xf32> -> vector<8x32xf32>
    %c0_3 = arith.constant 0 : index
    %c0_4 = arith.constant 0 : index
    %3 = vector.load %arg4[%c0_3, %c0_4] : memref<1x32xf32, #tpu.memory_space<vmem>>, vector<1x32xf32>
    %4 = vector.broadcast %3 : vector<1x32xf32> to vector<8x32xf32>
    %5 = arith.addf %2, %4 : vector<8x32xf32>
    %c0_5 = arith.constant 0 : index
    %c0_6 = arith.constant 0 : index
    %6 = vector.load %arg5[%c0_5, %c0_6] : memref<8x32xf32, #tpu.memory_space<vmem>>, vector<8x32xf32>
    tpu.vector_store %arg5[%c0_5, %c0_6], %5 {strides = array<i32>} : memref<8x32xf32, #tpu.memory_space<vmem>>, vector<8x32xf32>,
    return
  }
  func.func @transform_0(%arg0: i32, %arg1: i32) -> (i32, i32) {
    %c0_i32 = arith.constant 0 : i32
    %c0_i32_0 = arith.constant 0 : i32
    return %arg0, %c0_i32 : i32, i32
  }
  func.func @transform_1(%arg0: i32, %arg1: i32) -> (i32, i32) {
    %c0_i32 = arith.constant 0 : i32
    %c0_i32_0 = arith.constant 0 : i32
    return %c0_i32, %arg1 : i32, i32
  }
  func.func @transform_2(%arg0: i32, %arg1: i32) -> (i32, i32) {
    %c0_i32 = arith.constant 0 : i32
    %c0_i32_0 = arith.constant 0 : i32
    return %c0_i32, %arg1 : i32, i32
  }
  func.func @transform_3(%arg0: i32, %arg1: i32) -> (i32, i32) {
    %c0_i32 = arith.constant 0 : i32
    return %arg0, %arg1 : i32, i32
  }
}

</mosaic_0001>

<bundles_post_ra>
// kernel: fir_layer.1
= control target key start
LH: loop header
LB: loop body
LE: loop exit
PB: predicated region body
PF: predicated region fallthrough
CT: control target
= control target key end

     0   :  { %8 = vsyncpa [#allocation3], 0  ;;  %s267_s0 = inlined_call_operand.hbm [shape: f32[8,16], index: 0, kind: input, shape index: {}]   ;;  %s268_s1 = inlined_call_operand.hbm [shape: f32[16,32], index: 1, kind: input, shape index: {}]   ;;  %s269_s2 = inlined_call_operand.vmem [shape: f32[1,32], index: 2, kind: input, shape index: {}]   ;;  %s270_s3 = inlined_call_operand.hbm [shape: f32[8,32], index: 3, kind: output, shape index: {}]  }
   0x1   :  { %9 = vsyncpa [#allocation6], 0 }
   0x2   :  { %10 = vsyncpa [#allocation4], 0  ;;  %s228_s12 = smov [#allocation2]   ;;  %s229_s14 = smov [#allocation5]  }
   0x3   :  { %s17_s13 = sshll.u32 %s228_s12, 4  ;;  %s26_s15 = sshll.u32 %s229_s14, 4  ;;  %s18_s13 = int_to_ptr.vmem [resolvable:$true] %s17_s13  ;;  %s27_s15 = int_to_ptr.vmem [resolvable:$true] %s26_s15 }
   0x4   :  { %s170_s16 = scalar_lea.vmem %s18_s13, 128  ;;  %p175_p1 = scmp.lt.s32.totalorder %s18_s13, %s18_s13 }
   0x5   :  { %p171_p0 = scmp.ne.s32.totalorder %s18_s13, %s170_s16  ;;  %p176_p2 = scmp.lt.s32.totalorder %s170_s16, %s170_s16 }
   0x7   :  { %p177_p3 = por %p176_p2, %p175_p1 }
   0x9   :  { %p178_p4 = pnand %p177_p3, %p171_p0 }
   0xb   :  { %181 = shalt.err (!%p178_p4)
}
   0xc   :  { %20 = dma.hbm_to_vmem [thread:$0]  %s267_s0, 128, %s18_s13, [#allocation3]  }
   0xd   :  { %s190_s19 = scalar_lea.vmem %s27_s15, 256  ;;  %p195_p6 = scmp.lt.s32.totalorder %s27_s15, %s27_s15 }
   0xe   :  { %p191_p5 = scmp.ne.s32.totalorder %s27_s15, %s190_s19  ;;  %p196_p7 = scmp.lt.s32.totalorder %s190_s19, %s190_s19 }
  0x10   :  { %p197_p8 = por %p196_p7, %p195_p6 }
  0x12   :  { %p198_p9 = pnand %p197_p8, %p191_p5 }
  0x14   :  { %201 = shalt.err (!%p198_p9)
}
  0x15   :  { %s230_s20 = smov 128   ;;  %s231_s21 = smov 8  }
  0x16   :  { %32 = dma.hbm_to_vmem [thread:$0]  %s268_s1, 256, %s27_s15, [#allocation6], %s230_s20, %s230_s20, %s231_s21  }
  0x17   :  { %222 = dma.done.wait [#allocation3], 128  }
  0x18   :  { %223 = vsyncadd [#allocation3], 4294967168 }
  0x19   :  { %224 = dma.done.wait [#allocation6], 256  }
  0x1a   :  { %225 = vsyncadd [#allocation6], 4294967040  ;;  %v232_v0 = vmov 0.0   ;;  %vm233_vm0 = vmmov 0   ;;  %v43_v1 = vld [vmem:[#allocation5 + $0x8] sm:$0xff]  ;;  %v42_v2 = vld [vmem:[#allocation5] sm:$0xff] }
  0x1b   :  { %148 = vmatprep.subr.mxu0 %v232_v0  ;;  %152 = vmatprep.mubr.msk.f32.mxu0 %vm233_vm0, %v232_v0  ;;  %v41_v3 = vld [vmem:[#allocation2] sm:$0xff]  ;;  %vm51_vm1 = vcmask 130048   ;;  %s234_s1 = smov [#allocation7]   ;;  %vm125_vm2 = vcmask 261120  }
  0x1c   :  { %149 = vmatpush3.msra.mxu0 %v43_v1  ;;  %v143_v4 = vld [vmem:[%s269_s2] ss:$0 sm:$0xff]  ;;  %s133_s25 = sshll.u32 %s234_s1, 4  ;;  %s134_s25 = int_to_ptr.vmem [resolvable:$true] %s133_s25 }
  0x1d   :  { %150 = vmatprep.subr.mxu0 %v232_v0  ;;  %s202_s26 = scalar_lea.vmem %s134_s25, 128  ;;  %p207_p11 = scmp.lt.s32.totalorder %s134_s25, %s134_s25 }
  0x1e   :  { %151 = vmatpush3.msra.mxu0 %v42_v2  ;;  %p203_p10 = scmp.ne.s32.totalorder %s134_s25, %s202_s26  ;;  %p208_p12 = scmp.lt.s32.totalorder %s202_s26, %s202_s26 }
  0x1f   :  { %153 = vmatmul.mubr.msk.f32.vlgmr.msra.gmra.mxu0 %vm51_vm1, %v41_v3 }
  0x20   :  { %p209_p13 = por %p208_p12, %p207_p11 }
  0x22   :  { %p210_p0 = pnand %p209_p13, %p203_p10 }
  0xdf   :  { %v121_v5 = vpop.f32.mrf.mxu0 }
  0xe0   :  { %v122_v6 = vadd.f32 %v143_v4, %v121_v5 }
  0xe1   :  { %v154_v7 = vpop.f32.mrf.mxu0 }
  0xe2   :  { %126 = vst.msk [vmem:[#allocation7] sm:$0xff] %vm125_vm2, %v122_v6 }
  0xe3   :  { %213 = shalt.err (!%p210_p0)
}
  0xe4   :  { %136 = dma.vmem_to_hbm [thread:$0]  %s134_s25, 128, %s270_s3, [#allocation4]  }
  0xe5   :  { %226 = dma.done.wait [#allocation4], 128  }
  0xe6   :  { %227 = vsyncadd [#allocation4], 4294967168 }
  0xe7   :  { %140 = vsyncpa [#allocation3], 1 }
  0xe8   :  { %141 = vsyncpa [#allocation6], 1 }
  0xe9   :  { %142 = vsyncpa [#allocation4], 1 }

</bundles_post_ra>
